<compile_context>
chip_gen: v6e
topology: v6e:2x2x1
jax: 0.10.0
libtpu: 0.0.40
codegen_flags: <defaults>
</compile_context>

<pallas_src>
import functools

import jax
import jax.numpy as jnp
from jax.experimental import pallas as pl
from jax.experimental.pallas import tpu as pltpu

EPS = 1e-5  # nn.InstanceNorm2d default eps (affine=False, no learned scale/shift)


def _conv_in_relu_kernel(p_ref, w_ref, m_ref, out_ref, *, inv_p):
    """One grid step = `spb` batch samples, channel-major / lane-dense.

    p_ref  : (spb, Kp, HWp)  bf16  im2col patches (zero-padded K and spatial dims)
    w_ref  : (Cout, Kp)      bf16  flattened conv weights (zero-padded K dim)
    m_ref  : (1, HWp)        f32   1.0 on the Ho*Wo real output pixels, else 0.0
    out_ref: (spb, Cout, HWp) f32  conv + InstanceNorm + ReLU, flattened spatial
    """
    w = w_ref[...]
    m = m_ref[...]
    for s in range(out_ref.shape[0]):  # static & tiny (1 or 2) -> unrolled
        # Single fused MXU matmul: K = Cin*KH*KW, bf16 operands, f32 accumulation.
        acc = jnp.dot(w, p_ref[s], preferred_element_type=jnp.float32)  # (Cout, HWp)

        # Padded columns of acc are exactly zero (zero patches, no bias), so the
        # mean needs no mask; only the centered-square sum does.
        mean = jnp.sum(acc, axis=1, keepdims=True) * inv_p              # (Cout, 1)
        cent = acc - mean
        var = jnp.sum(cent * cent * m, axis=1, keepdims=True) * inv_p   # (Cout, 1)

        # InstanceNorm2d (biased variance, eps inside rsqrt) + ReLU, all f32.
        out_ref[s] = jnp.maximum(cent * jax.lax.rsqrt(var + EPS), 0.0).astype(
            out_ref.dtype)


def _tensorcores_per_chip() -> int:
    """v7x exposes 2 TensorCores per chip; v5e/v6e have 1.

    Used only as a perf heuristic (both resulting grid layouts are correct), so
    fall back to 1 on any doubt.
    """
    try:
        kind = jax.devices()[0].device_kind.lower()
    except Exception:
        return 1
    return 2 if "v7" in kind else 1


@jax.jit
def common_convolution_block(x_nchw, weight, bias=None):
    """Conv2d(stride=1, padding=0) + InstanceNorm2d(affine=False) + ReLU.

    x_nchw : (N, Cin, H, W) float32
    weight : (Cout, Cin, KH, KW) float32 (PyTorch Conv2d layout)
    bias   : (Cout,) float32 — accepted for API parity but unused: a per-channel
             constant is cancelled exactly by InstanceNorm's mean subtraction.
    returns: (N, Cout, Ho, Wo) float32
    """
    del bias  # mathematically a no-op under InstanceNorm(affine=False)

    N, Cin, H, W = x_nchw.shape
    Cout, _, KH, KW = weight.shape
    Ho, Wo = H - KH + 1, W - KW + 1
    P = Ho * Wo                          # true spatial count for the norm stats
    K = Cin * KH * KW                    # fused contraction dim (e.g. 36)
    Kp = ((K + 15) // 16) * 16           # pad to the bf16 sublane tile (36 -> 48)
    HWp = ((P + 127) // 128) * 128       # lane-dense output spatial dim

    # --- host glue (layout only, fused by XLA under jit) ----------------------
    xb = x_nchw.astype(jnp.bfloat16)
    # patches[n, c*KH*KW + kh*KW + kw, i*Wo + j] = x[n, c, i+kh, j+kw]
    taps = [xb[:, :, kh:kh + Ho, kw:kw + Wo]
            for kh in range(KH) for kw in range(KW)]
    patches = jnp.stack(taps, axis=2).reshape(N, K, P)
    patches = jnp.pad(patches, ((0, 0), (0, Kp - K), (0, HWp - P)))

    w_mat = jnp.pad(weight.astype(jnp.bfloat16).reshape(Cout, K),
                    ((0, 0), (0, Kp - K)))
    mask = (jnp.arange(HWp, dtype=jnp.int32) < P).astype(jnp.float32)[None, :]

    # --- grid heuristic --------------------------------------------------------
    n_tc = _tensorcores_per_chip()
    spb = N // n_tc if (N % n_tc == 0) else 1        # samples per grid step
    step_bytes = spb * (Kp * HWp * 2 + Cout * HWp * 4)
    if step_bytes > (4 << 20):                       # keep blocks double-bufferable
        spb = 1
    n_steps = N // spb

    kernel = functools.partial(_conv_in_relu_kernel, inv_p=1.0 / P)

    out_flat = pl.pallas_call(
        kernel,
        out_shape=jax.ShapeDtypeStruct((N, Cout, HWp), jnp.float32),
        grid=(n_steps,),
        in_specs=[
            pl.BlockSpec((spb, Kp, HWp), lambda g: (g, 0, 0)),
            pl.BlockSpec((Cout, Kp), lambda g: (0, 0)),   # resident across steps
            pl.BlockSpec((1, HWp), lambda g: (0, 0)),     # resident across steps
        ],
        out_specs=pl.BlockSpec((spb, Cout, HWp), lambda g: (g, 0, 0)),
        compiler_params=pltpu.CompilerParams(
            dimension_semantics=("parallel",)),
    )(patches, w_mat, mask)

    # Already channel-major: crop the lane padding and reshape to NCHW (free).
    return out_flat[:, :, :P].reshape(N, Cout, Ho, Wo)


def _reference(x_nchw, weight, bias):
    """Pure-JAX f32 reference (Conv2d + bias + InstanceNorm2d + ReLU)."""
    conv = jax.lax.conv_general_dilated(
        x_nchw, weight, window_strides=(1, 1), padding="VALID",
        dimension_numbers=("NCHW", "OIHW", "NCHW"))
    conv = conv + bias.reshape(1, -1, 1, 1)   # kept here to show it cancels
    mean = jnp.mean(conv, axis=(2, 3), keepdims=True)
    var = jnp.mean((conv - mean) ** 2, axis=(2, 3), keepdims=True)
    return jnp.maximum((conv - mean) * jax.lax.rsqrt(var + EPS), 0.0)


if __name__ == "__main__":
    # Module config: in_channels=4, out_channels=8, filters=3, down_sample=True
    N, Cin, H, W = 2, 4, 16, 16
    Cout, KH, KW = 8, 3, 3

    key = jax.random.PRNGKey(0)
    kx, kwt, kb = jax.random.split(key, 3)

    x = jax.random.normal(kx, (N, Cin, H, W), dtype=jnp.float32)
    # Deterministic synthetic parameters (PyTorch-like uniform init scale).
    fan_in = Cin * KH * KW
    bound = 1.0 / (fan_in ** 0.5)
    weight = jax.random.uniform(kwt, (Cout, Cin, KH, KW), jnp.float32, -bound, bound)
    bias = jax.random.uniform(kb, (Cout,), jnp.float32, -bound, bound)

    out = jax.block_until_ready(common_convolution_block(x, weight, bias))
    ref = jax.block_until_ready(_reference(x, weight, bias))

    assert out.shape == (N, Cout, H - KH + 1, W - KW + 1)
    # bf16 MXU operands (f32 accumulate / f32 norm) vs. the f32 reference:
    # loosened tolerance per the review; worst-case rounding error is < 2e-2.
    assert jnp.allclose(out, ref, atol=3e-2, rtol=3e-2)

    print("KERNEL_OK")
</pallas_src>

<mosaic_0001>
module attributes {stable_mosaic.version = 11 : i64} {
  func.func @_conv_in_relu_kernel(%arg0: i32, %arg1: memref<2x48x256xbf16, #tpu.memory_space<vmem>>, %arg2: memref<8x48xbf16, #tpu.memory_space<vmem>>, %arg3: memref<1x256xf32, #tpu.memory_space<vmem>>, %arg4: memref<2x8x256xf32, #tpu.memory_space<vmem>>) attributes {dimension_semantics = [#tpu.dimension_semantics<parallel>], iteration_bounds = array<i64: 1>, scalar_prefetch = 0 : i64, scratch_operands = 0 : i64, tpu.core_type = #tpu.core_type<tc>, window_params = [{transform_indices = @transform_0, window_bounds = array<i64: 2, 48, 256>}, {pipeline_mode = #tpu.pipeline_mode<synchronous>, transform_indices = @transform_1, window_bounds = array<i64: 8, 48>}, {pipeline_mode = #tpu.pipeline_mode<synchronous>, transform_indices = @transform_2, window_bounds = array<i64: 1, 256>}, {transform_indices = @transform_3, window_bounds = array<i64: 2, 8, 256>}]} {
    %c0 = arith.constant 0 : index
    %c0_0 = arith.constant 0 : index
    %0 = vector.load %arg2[%c0, %c0_0] : memref<8x48xbf16, #tpu.memory_space<vmem>>, vector<8x48xbf16>
    %c0_1 = arith.constant 0 : index
    %c0_2 = arith.constant 0 : index
    %1 = vector.load %arg3[%c0_1, %c0_2] : memref<1x256xf32, #tpu.memory_space<vmem>>, vector<1x256xf32>
    %c0_3 = arith.constant 0 : index
    %c0_4 = arith.constant 0 : index
    %c0_5 = arith.constant 0 : index
    %2 = vector.load %arg1[%c0_3, %c0_4, %c0_5] : memref<2x48x256xbf16, #tpu.memory_space<vmem>>, vector<1x48x256xbf16>
    %3 = vector.shape_cast %2 : vector<1x48x256xbf16> to vector<48x256xbf16>
    %cst = arith.constant dense<0.000000e+00> : vector<8x256xf32>
    %4 = tpu.matmul %0, %3, %cst {dimension_numbers = #tpu.dot_dimension_numbers<[1], [0], [0], [1], [0, 0, 1, 1], [], []>} : vector<8x48xbf16>, vector<48x256xbf16>, vector<8x256xf32> -> vector<8x256xf32>
    %cst_6 = arith.constant dense<0.000000e+00> : vector<8xf32>
    %5 = vector.multi_reduction <add>, %4, %cst_6 [1] : vector<8x256xf32> to vector<8xf32>
    %6 = vector.shape_cast %5 : vector<8xf32> to vector<8x1xf32>
    %cst_7 = arith.constant 0.00510204071 : f32
    %7 = vector.broadcast %cst_7 : f32 to vector<8x1xf32>
    %8 = arith.mulf %6, %7 : vector<8x1xf32>
    %9 = vector.broadcast %8 : vector<8x1xf32> to vector<8x256xf32>
    %10 = arith.subf %4, %9 : vector<8x256xf32>
    %11 = arith.mulf %10, %10 : vector<8x256xf32>
    %12 = vector.broadcast %1 : vector<1x256xf32> to vector<8x256xf32>
    %13 = arith.mulf %11, %12 : vector<8x256xf32>
    %cst_8 = arith.constant dense<0.000000e+00> : vector<8xf32>
    %14 = vector.multi_reduction <add>, %13, %cst_8 [1] : vector<8x256xf32> to vector<8xf32>
    %15 = vector.shape_cast %14 : vector<8xf32> to vector<8x1xf32>
    %cst_9 = arith.constant 0.00510204071 : f32
    %16 = vector.broadcast %cst_9 : f32 to vector<8x1xf32>
    %17 = arith.mulf %15, %16 : vector<8x1xf32>
    %cst_10 = arith.constant 9.99999974E-6 : f32
    %18 = vector.broadcast %cst_10 : f32 to vector<8x1xf32>
    %19 = arith.addf %17, %18 : vector<8x1xf32>
    %20 = math.rsqrt %19 : vector<8x1xf32>
    %21 = vector.broadcast %20 : vector<8x1xf32> to vector<8x256xf32>
    %22 = arith.mulf %10, %21 : vector<8x256xf32>
    %cst_11 = arith.constant 0.000000e+00 : f32
    %23 = vector.broadcast %cst_11 : f32 to vector<8x256xf32>
    %24 = arith.maximumf %22, %23 : vector<8x256xf32>
    %c0_12 = arith.constant 0 : index
    %c0_13 = arith.constant 0 : index
    %c0_14 = arith.constant 0 : index
    %25 = vector.load %arg4[%c0_12, %c0_13, %c0_14] : memref<2x8x256xf32, #tpu.memory_space<vmem>>, vector<1x8x256xf32>
    %26 = vector.shape_cast %25 : vector<1x8x256xf32> to vector<8x256xf32>
    %27 = vector.shape_cast %24 : vector<8x256xf32> to vector<1x8x256xf32>
    tpu.vector_store %arg4[%c0_12, %c0_13, %c0_14], %27 {strides = array<i32>} : memref<2x8x256xf32, #tpu.memory_space<vmem>>, vector<1x8x256xf32>,
    %c1 = arith.constant 1 : index
    %c0_15 = arith.constant 0 : index
    %c0_16 = arith.constant 0 : index
    %28 = vector.load %arg1[%c1, %c0_15, %c0_16] : memref<2x48x256xbf16, #tpu.memory_space<vmem>>, vector<1x48x256xbf16>
    %29 = vector.shape_cast %28 : vector<1x48x256xbf16> to vector<48x256xbf16>
    %cst_17 = arith.constant dense<0.000000e+00> : vector<8x256xf32>
    %30 = tpu.matmul %0, %29, %cst_17 {dimension_numbers = #tpu.dot_dimension_numbers<[1], [0], [0], [1], [0, 0, 1, 1], [], []>} : vector<8x48xbf16>, vector<48x256xbf16>, vector<8x256xf32> -> vector<8x256xf32>
    %cst_18 = arith.constant dense<0.000000e+00> : vector<8xf32>
    %31 = vector.multi_reduction <add>, %30, %cst_18 [1] : vector<8x256xf32> to vector<8xf32>
    %32 = vector.shape_cast %31 : vector<8xf32> to vector<8x1xf32>
    %cst_19 = arith.constant 0.00510204071 : f32
    %33 = vector.broadcast %cst_19 : f32 to vector<8x1xf32>
    %34 = arith.mulf %32, %33 : vector<8x1xf32>
    %35 = vector.broadcast %34 : vector<8x1xf32> to vector<8x256xf32>
    %36 = arith.subf %30, %35 : vector<8x256xf32>
    %37 = arith.mulf %36, %36 : vector<8x256xf32>
    %38 = vector.broadcast %1 : vector<1x256xf32> to vector<8x256xf32>
    %39 = arith.mulf %37, %38 : vector<8x256xf32>
    %cst_20 = arith.constant dense<0.000000e+00> : vector<8xf32>
    %40 = vector.multi_reduction <add>, %39, %cst_20 [1] : vector<8x256xf32> to vector<8xf32>
    %41 = vector.shape_cast %40 : vector<8xf32> to vector<8x1xf32>
    %cst_21 = arith.constant 0.00510204071 : f32
    %42 = vector.broadcast %cst_21 : f32 to vector<8x1xf32>
    %43 = arith.mulf %41, %42 : vector<8x1xf32>
    %cst_22 = arith.constant 9.99999974E-6 : f32
    %44 = vector.broadcast %cst_22 : f32 to vector<8x1xf32>
    %45 = arith.addf %43, %44 : vector<8x1xf32>
    %46 = math.rsqrt %45 : vector<8x1xf32>
    %47 = vector.broadcast %46 : vector<8x1xf32> to vector<8x256xf32>
    %48 = arith.mulf %36, %47 : vector<8x256xf32>
    %cst_23 = arith.constant 0.000000e+00 : f32
    %49 = vector.broadcast %cst_23 : f32 to vector<8x256xf32>
    %50 = arith.maximumf %48, %49 : vector<8x256xf32>
    %c1_24 = arith.constant 1 : index
    %c0_25 = arith.constant 0 : index
    %c0_26 = arith.constant 0 : index
    %51 = vector.load %arg4[%c1_24, %c0_25, %c0_26] : memref<2x8x256xf32, #tpu.memory_space<vmem>>, vector<1x8x256xf32>
    %52 = vector.shape_cast %51 : vector<1x8x256xf32> to vector<8x256xf32>
    %53 = vector.shape_cast %50 : vector<8x256xf32> to vector<1x8x256xf32>
    tpu.vector_store %arg4[%c1_24, %c0_25, %c0_26], %53 {strides = array<i32>} : memref<2x8x256xf32, #tpu.memory_space<vmem>>, vector<1x8x256xf32>,
    return
  }
  func.func @transform_0(%arg0: i32) -> (i32, i32, i32) {
    %c0_i32 = arith.constant 0 : i32
    %c0_i32_0 = arith.constant 0 : i32
    %c0_i32_1 = arith.constant 0 : i32
    return %arg0, %c0_i32, %c0_i32_0 : i32, i32, i32
  }
  func.func @transform_1(%arg0: i32) -> (i32, i32) {
    %c0_i32 = arith.constant 0 : i32
    %c0_i32_0 = arith.constant 0 : i32
    %c0_i32_1 = arith.constant 0 : i32
    return %c0_i32, %c0_i32_0 : i32, i32
  }
  func.func @transform_2(%arg0: i32) -> (i32, i32) {
    %c0_i32 = arith.constant 0 : i32
    %c0_i32_0 = arith.constant 0 : i32
    %c0_i32_1 = arith.constant 0 : i32
    return %c0_i32, %c0_i32_0 : i32, i32
  }
  func.func @transform_3(%arg0: i32) -> (i32, i32, i32) {
    %c0_i32 = arith.constant 0 : i32
    %c0_i32_0 = arith.constant 0 : i32
    %c0_i32_1 = arith.constant 0 : i32
    return %arg0, %c0_i32, %c0_i32_0 : i32, i32, i32
  }
}

</mosaic_0001>

<bundles_post_ra>
// kernel: common_convolution_block.1
= control target key start
LH: loop header
LB: loop body
LE: loop exit
PB: predicated region body
PF: predicated region fallthrough
CT: control target
= control target key end

     0   :  { %v281_v1 = vmov 0   ;;  %vm53_vm0 = vcmask 392192   ;;  %v107_v24 = vlaneseq  ;;  %s356_s0 = inlined_call_operand.vmem [shape: bf16[2,48,256], index: 0, kind: input, shape index: {}]   ;;  %s357_s1 = inlined_call_operand.vmem [shape: bf16[8,48], index: 1, kind: input, shape index: {}]   ;;  %s358_s2 = inlined_call_operand.vmem [shape: f32[1,256], index: 2, kind: input, shape index: {}]   ;;  %s359_s3 = inlined_call_operand.vmem [shape: f32[2,8,256], index: 3, kind: output, shape index: {}]  }
   0x1   :  { %v259_v0 = vld [vmem:[%s356_s0 + $0x24] ss:$8 sps:$4 sm:$0xff]   ;;  %89 = vmatprep.mubr.bf16.mxu0 %v281_v1  ;;  %200 = vmatprep.mubr.bf16.mxu1 %v281_v1  ;;  %v261_v2 = vld [vmem:[%s356_s0 + $0x54] ss:$8 sps:$4 sm:$0xff]   ;;  %v263_v3 = vld [vmem:[%s356_s0 + $0x20] ss:$8 sps:$4 sm:$0xff]  }
   0x2   :  { %67 = vmatprep.subr.bf16.mxu0 %v259_v0  ;;  %v264_v4 = vld [vmem:[%s356_s0 + $0x50] ss:$8 sps:$4 sm:$0xff]   ;;  %178 = vmatprep.subr.bf16.mxu1 %v261_v2  ;;  %v265_v5 = vld [vmem:[%s356_s0 + $0x14] ss:$8 sps:$4 sm:$0xff]   ;;  %v267_v6 = vld [vmem:[%s356_s0 + $0x44] ss:$8 sps:$4 sm:$0xff]  }
   0x3   :  { %68 = vmatpush1.bf16.msra.mxu0 %v263_v3  ;;  %179 = vmatpush1.bf16.msra.mxu1 %v264_v4  ;;  %v269_v7 = vld [vmem:[%s356_s0 + $0x10] ss:$8 sps:$4 sm:$0xff]   ;;  %v270_v8 = vld [vmem:[%s356_s0 + $0x40] ss:$8 sps:$4 sm:$0xff]   ;;  %v271_v9 = vld [vmem:[%s356_s0 + $0x4] ss:$8 sps:$4 sm:$0xff]  }
   0x4   :  { %69 = vmatprep.subr.bf16.mxu0 %v265_v5  ;;  %180 = vmatprep.subr.bf16.mxu1 %v267_v6  ;;  %v273_v10 = vld [vmem:[%s356_s0 + $0x34] ss:$8 sps:$4 sm:$0xff]   ;;  %v275_v11 = vld [vmem:[%s356_s0] ss:$8 sps:$4 sm:$0xff]   ;;  %v276_v12 = vld [vmem:[%s356_s0 + $0x30] ss:$8 sps:$4 sm:$0xff]  }
   0x5   :  { %v15_v13 = vld [vmem:[%s357_s1] sm:$0xf]  ;;  %v108_v25 = vshrl.u32 %v107_v24, 7 }
   0x6   :  { %v16_v29 = vld [vmem:[%s358_s2] sm:$0x3] }
   0x7   :  { %70 = vmatpush1.bf16.msra.mxu0 %v269_v7  ;;  %181 = vmatpush1.bf16.msra.mxu1 %v270_v8  ;;  %v109_v26 = vsub.s32 0, %v108_v25  ;;  %v113_v27 = vsub.s32 1, %v108_v25 }
   0x8   :  { %71 = vmatprep.subr.bf16.mxu0 %v271_v9  ;;  %182 = vmatprep.subr.bf16.mxu1 %v273_v10 }
   0x9   :  { %v110_v33 = vrot.slane %v16_v29, %v109_v26  ;;  %v114_v34 = vrot.slane %v16_v29, %v113_v27 }
   0xb   :  { %72 = vmatpush1.bf16.msra.mxu0 %v275_v11  ;;  %183 = vmatpush1.bf16.msra.mxu1 %v276_v12 }
   0xe   :  { %242 = vmatmul.mubr.msk.bf16.vlgmr.msra.gmra.mxu0 %vm53_vm0, %v15_v13  ;;  %255 = vmatmul.mubr.msk.bf16.vlgmr.msra.gmra.mxu1 %vm53_vm0, %v15_v13 }
  0xce   :  { %v91_v14 = vpop.f32.mrf.mxu0  ;;  %v202_v15 = vpop.f32.mrf.mxu1 }
  0xd0   :  { %v93_v16 = vpop.f32.mrf.mxu0  ;;  %v204_v17 = vpop.f32.mrf.mxu1 }
  0xd1   :  { %v98_v18 = vadd.f32 %v93_v16, %v91_v14  ;;  %v209_v23 = vadd.f32 %v204_v17, %v202_v15 }
  0xd2   :  { %v95_v19 = vpop.f32.mrf.mxu0  ;;  %v206_v20 = vpop.f32.mrf.mxu1 }
  0xd3   :  { %99 = vadd.xlane.f32.xlu0 %v98_v18 }
  0xd4   :  { %v96_v21 = vpop.f32.mrf.mxu0  ;;  %v207_v22 = vpop.f32.mrf.mxu1 }
  0xd7   :  { %210 = vadd.xlane.f32.xlu0 %v209_v23 }
 0x15c   :  { %v100_v28 = vpop.xlane.xlu0 %99 }
 0x15d   :  { %v101_v30 = vmul.f32 0.0051020407, %v100_v28 }
 0x15f   :  { %v102_v31 = vsub.f32 %v91_v14, %v101_v30  ;;  %v103_v32 = vsub.f32 %v93_v16, %v101_v30 }
 0x160   :  { %v211_v35 = vpop.xlane.xlu0 %210 }
 0x161   :  { %v212_v36 = vmul.f32 0.0051020407, %v211_v35  ;;  %v104_v37 = vmul.f32 %v102_v31, %v102_v31  ;;  %v105_v38 = vmul.f32 %v103_v32, %v103_v32 }
 0x163   :  { %v213_v39 = vsub.f32 %v202_v15, %v212_v36  ;;  %v214_v40 = vsub.f32 %v204_v17, %v212_v36  ;;  %v117_v41 = vmul.f32 %v110_v33, %v104_v37  ;;  %v118_v42 = vmul.f32 %v114_v34, %v105_v38 }
 0x165   :  { %v215_v43 = vmul.f32 %v213_v39, %v213_v39  ;;  %v216_v44 = vmul.f32 %v214_v40, %v214_v40  ;;  %v119_v45 = vadd.f32 %v118_v42, %v117_v41 }
 0x167   :  { %120 = vadd.xlane.f32.xlu1 %v119_v45  ;;  %v217_v46 = vmul.f32 %v215_v43, %v110_v33  ;;  %v218_v47 = vmul.f32 %v216_v44, %v114_v34 }
 0x169   :  { %v219_v48 = vadd.f32 %v218_v47, %v217_v46 }
 0x16b   :  { %220 = vadd.xlane.f32.xlu1 %v219_v48 }
 0x1f0   :  { %v121_v49 = vpop.xlane.xlu1 %120 }
 0x1f1   :  { %v122_v50 = vmul.f32 0.0051020407, %v121_v49 }
 0x1f3   :  { %v123_v51 = vadd.f32 1e-05, %v122_v50 }
 0x1f4   :  { %v221_v52 = vpop.xlane.xlu1 %220 }
 0x1f5   :  { %277 = vrsqrt.f32 %v123_v51  ;;  %v222_v53 = vmul.f32 0.0051020407, %v221_v52 }
 0x1f7   :  { %v223_v54 = vadd.f32 1e-05, %v222_v53 }
 0x1f9   :  { %279 = vrsqrt.f32 %v223_v54 }
 0x202   :  { %v278_v55 = vpop.eup %277 }
 0x203   :  { %v125_v56 = vmul.f32 %v278_v55, %v102_v31  ;;  %v126_v57 = vmul.f32 %v278_v55, %v103_v32 }
 0x205   :  { %v127_v58 = vmax.f32 %v125_v56, 0.0  ;;  %v128_v59 = vmax.f32 %v126_v57, 0.0 }
 0x206   :  { %v280_v60 = vpop.eup %279 }
 0x207   :  { %129 = vst [vmem:[%s359_s3] sm:$0xff] %v127_v58  ;;  %130 = vst [vmem:[%s359_s3 + $0x8] sm:$0xff] %v128_v59  ;;  %v225_v61 = vmul.f32 %v280_v60, %v213_v39  ;;  %v226_v62 = vmul.f32 %v280_v60, %v214_v40 }
 0x209   :  { %v227_v63 = vmax.f32 %v225_v61, 0.0  ;;  %v228_v0 = vmax.f32 %v226_v62, 0.0 }
 0x20b   :  { %256 = vst [vmem:[%s359_s3 + $0x10] sm:$0xff] %v227_v63  ;;  %257 = vst [vmem:[%s359_s3 + $0x18] sm:$0xff] %v228_v0 }

</bundles_post_ra>
